<compile_context>
chip_gen: v6e
topology: v6e:2x2x1
jax: 0.10.0
libtpu: 0.0.40
codegen_flags: <defaults>
</compile_context>

<pallas_src>
import functools

import jax
import jax.numpy as jnp
from jax.experimental import pallas as pl
from jax.experimental.pallas import tpu as pltpu


def _round_up(x, m):
    return ((x + m - 1) // m) * m


def _vmem_budget_bytes():
    """~3/4 of physical VMEM (64 MiB on v7x, 128 MiB on v5e/v6e)."""
    phys = 64 * 1024 * 1024  # conservative fallback (v7x)
    try:
        info = pltpu.get_tpu_info()
        phys = int(getattr(info, "vmem_capacity_bytes", phys))
    except Exception:
        pass
    return (phys * 3) // 4


# ---------------------------------------------------------------------------
# Kernel 1: feature projection  h = X @ W^T   (computed once, stored as bf16)
# ---------------------------------------------------------------------------
def feature_proj_kernel(x_ref, wt_ref, h_ref):
    h_ref[...] = jnp.dot(
        x_ref[...], wt_ref[...], preferred_element_type=jnp.float32
    ).astype(h_ref.dtype)


# ---------------------------------------------------------------------------
# Kernel 2: out = sigmoid(Ahat @ h + bias), block-sparse over adjacency tiles.
#   cb_ref  : [nR, nKeff] i32 SMEM — non-empty column-block indices per row tile
#             (padded tail repeats the last valid index -> no redundant DMA)
#   cnt_ref : [nR]        i32 SMEM — number of non-empty column blocks per row tile
# The output block is resident across the K axis (index_map ignores k) and is
# used directly as the f32 accumulator.
# ---------------------------------------------------------------------------
def adj_matmul_kernel(cb_ref, cnt_ref, adj_ref, h_ref, b_ref, o_ref, *, tk, h_resident):
    i = pl.program_id(0)
    k = pl.program_id(1)

    if h_resident:
        # h is the full (Np_c, Cp) block resident in VMEM; slice the column
        # block in-VMEM at a 128-aligned dynamic offset.
        start = pl.multiple_of(cb_ref[i, k] * tk, 128)
        h_blk = h_ref[pl.ds(start, tk), :]
    else:
        h_blk = h_ref[...]

    # Fused init + first accumulate: k == 0 is always a real (non-padded)
    # column block because self-loops guarantee >= 1 non-empty block per row.
    @pl.when(k == 0)
    def _first():
        o_ref[...] = jnp.dot(adj_ref[...], h_blk, preferred_element_type=jnp.float32)

    @pl.when(jnp.logical_and(k > 0, k < cnt_ref[i]))
    def _accumulate():
        o_ref[...] += jnp.dot(adj_ref[...], h_blk, preferred_element_type=jnp.float32)

    @pl.when(k == pl.num_programs(1) - 1)
    def _finalize():
        z = o_ref[...] + b_ref[...]
        # sigmoid via EUP exp + approximate reciprocal (free slots next to MXU/vld)
        o_ref[...] = pl.reciprocal(1.0 + jnp.exp(-z), approx=True).astype(o_ref.dtype)


# ---------------------------------------------------------------------------
# Plain-JAX glue: dense GCN-normalized adjacency Ahat[target, source]
# ---------------------------------------------------------------------------
def build_normalized_adjacency(edge_index, edge_weight, num_nodes, padded_shape):
    src, dst = edge_index[0], edge_index[1]
    loop_idx = jnp.arange(num_nodes, dtype=edge_index.dtype)
    src = jnp.concatenate([src, loop_idx])
    dst = jnp.concatenate([dst, loop_idx])
    w = jnp.concatenate(
        [edge_weight.astype(jnp.float32), jnp.ones((num_nodes,), jnp.float32)]
    )
    deg = jnp.zeros((num_nodes,), jnp.float32).at[dst].add(w)
    deg_inv_sqrt = jnp.where(deg > 0, jax.lax.rsqrt(deg), 0.0)
    norm = deg_inv_sqrt[src] * w * deg_inv_sqrt[dst]
    adj = jnp.zeros(padded_shape, jnp.float32).at[dst, src].add(norm)
    return adj, src, dst


# ---------------------------------------------------------------------------
# Wrapper (call eagerly: block-sparsity metadata is computed host-side)
# ---------------------------------------------------------------------------
def graph_conv_forward(x, edge_index, edge_weight, weight, bias, *, tm=512, tk=1024):
    """x:[N,F] f32, edge_index:[2,E] i32, edge_weight:[E] f32,
    weight:[C,F] (PyTorch Linear layout), bias:[C] -> sigmoid(GCNConv(x)) [N,C]."""
    N, F = x.shape
    C = weight.shape[0]

    f32 = jnp.float32
    bf16 = jnp.bfloat16

    Fp = _round_up(F, 128)  # lane-dense feature dim
    Cp = _round_up(C, 128)  # lane-dense class dim

    # --- tile sizes: respect (16,128) packing, clamp to problem size, fit VMEM ---
    budget = _vmem_budget_bytes()
    TM = min(_round_up(N, 16), _round_up(tm, 16))     # adjacency row (target) tile
    TK = min(_round_up(N, 128), _round_up(tk, 128))   # adjacency col (source) tile

    def k2_vmem(TM_, TK_, h_res):
        Np_c_ = _round_up(N, TK_)
        adj_b = 2 * TM_ * TK_ * 2                       # bf16 adj, double-buffered
        h_b = 2 * (Np_c_ * Cp if h_res else TK_ * Cp) * 2
        out_b = 2 * TM_ * Cp * 4                        # f32 resident output
        bias_b = 2 * Cp * 4
        return adj_b + h_b + out_b + bias_b

    while True:
        h_resident = k2_vmem(TM, TK, True) <= budget
        if h_resident or k2_vmem(TM, TK, False) <= budget:
            break
        if TK > 128:
            TK = max(128, _round_up(TK // 2, 128))
        elif TM > 16:
            TM = max(16, _round_up(TM // 2, 16))
        else:
            break

    Np_r = _round_up(N, TM)   # padded target count
    Np_c = _round_up(N, TK)   # padded source count
    nR = Np_r // TM
    nK = Np_c // TK
    vmem_limit = int(budget)

    # --- dense normalized adjacency (padded), bf16 for HBM traffic + MXU --------
    adj, src_all, dst_all = build_normalized_adjacency(
        edge_index, edge_weight, N, (Np_r, Np_c)
    )
    adj_bf16 = adj.astype(bf16)

    # --- block-sparsity metadata from edge coordinates: O(E), not O(N^2) --------
    blk_any = (
        jnp.zeros((nR, nK), jnp.bool_).at[dst_all // TM, src_all // TK].set(True)
    )
    counts = blk_any.sum(axis=1).astype(jnp.int32)                        # [nR]
    nK_eff = max(int(counts.max()), 1)  # trimmed K extent (host-side, eager)
    order = jnp.argsort(jnp.logical_not(blk_any).astype(jnp.int32), axis=1)
    order = order.astype(jnp.int32)[:, :nK_eff]                           # nonzero first
    j_idx = jnp.arange(nK_eff, dtype=jnp.int32)[None, :]
    last_valid = jnp.take_along_axis(
        order, jnp.maximum(counts - 1, 0)[:, None], axis=1
    )
    col_blocks = jnp.where(j_idx < counts[:, None], order, last_valid)    # [nR,nK_eff]

    # --- padded operands ---------------------------------------------------------
    xp = jnp.zeros((Np_c, Fp), bf16).at[:N, :F].set(x.astype(bf16))
    wtp = jnp.zeros((Fp, Cp), bf16).at[:F, :C].set(weight.T.astype(bf16))
    b2d = jnp.zeros((1, Cp), f32).at[0, :C].set(bias.astype(f32))

    # --- kernel 1: h = X @ W^T  (row-tiled, computed once) ------------------------
    TMh = TK  # multiple of 128, divides Np_c
    h = pl.pallas_call(
        feature_proj_kernel,
        out_shape=jax.ShapeDtypeStruct((Np_c, Cp), bf16),
        grid=(Np_c // TMh,),
        in_specs=[
            pl.BlockSpec((TMh, Fp), lambda i: (i, 0)),
            pl.BlockSpec((Fp, Cp), lambda i: (0, 0)),
        ],
        out_specs=pl.BlockSpec((TMh, Cp), lambda i: (i, 0)),
        compiler_params=pltpu.CompilerParams(
            dimension_semantics=("parallel",),
            vmem_limit_bytes=vmem_limit,
        ),
    )(xp, wtp)

    # --- kernel 2: sigmoid(Ahat @ h + bias), tiled + block-sparse K axis ----------
    if h_resident:
        h_spec = pl.BlockSpec((Np_c, Cp), lambda i, k, cb, cnt: (0, 0))
    else:
        h_spec = pl.BlockSpec((TK, Cp), lambda i, k, cb, cnt: (cb[i, k], 0))

    out_padded = pl.pallas_call(
        functools.partial(adj_matmul_kernel, tk=TK, h_resident=h_resident),
        out_shape=jax.ShapeDtypeStruct((Np_r, Cp), f32),
        grid_spec=pltpu.PrefetchScalarGridSpec(
            num_scalar_prefetch=2,
            grid=(nR, nK_eff),
            in_specs=[
                pl.BlockSpec((TM, TK), lambda i, k, cb, cnt: (i, cb[i, k])),
                h_spec,
                pl.BlockSpec((1, Cp), lambda i, k, cb, cnt: (0, 0)),
            ],
            out_specs=pl.BlockSpec((TM, Cp), lambda i, k, cb, cnt: (i, 0)),
        ),
        compiler_params=pltpu.CompilerParams(
            dimension_semantics=("parallel", "arbitrary"),
            vmem_limit_bytes=vmem_limit,
        ),
    )(col_blocks, counts, adj_bf16, h, b2d)

    return out_padded[:N, :C]


if __name__ == "__main__":
    key = jax.random.PRNGKey(0)
    N, n_feat, n_class = 16, 8, 4  # small graph: 16 nodes

    k_x, k_w, k_e, k_ew = jax.random.split(key, 4)

    # node features
    x = jax.random.normal(k_x, (N, n_feat), dtype=jnp.float32)

    # deterministic synthetic graph: ring edges (both directions) + a few extras
    src = jnp.concatenate(
        [jnp.arange(N), (jnp.arange(N) + 1) % N, jnp.array([0, 3, 7, 11])]
    )
    dst = jnp.concatenate(
        [(jnp.arange(N) + 1) % N, jnp.arange(N), jnp.array([8, 12, 2, 5])]
    )
    edge_index = jnp.stack([src, dst]).astype(jnp.int32)  # [2, E]
    E = edge_index.shape[1]
    edge_weight = jax.random.uniform(
        k_ew, (E,), dtype=jnp.float32, minval=0.1, maxval=1.0
    )

    # GCNConv params: glorot-uniform weight [n_class, n_feat], zero bias [n_class]
    limit = jnp.sqrt(6.0 / (n_feat + n_class))
    weight = jax.random.uniform(
        k_w, (n_class, n_feat), dtype=jnp.float32, minval=-limit, maxval=limit
    )
    bias = jnp.zeros((n_class,), jnp.float32)

    out = graph_conv_forward(x, edge_index, edge_weight, weight, bias)
    out = jax.block_until_ready(out)

    # sanity check vs pure-JAX f32 reference (bf16 matmuls -> loose tolerance)
    adj_ref, _, _ = build_normalized_adjacency(edge_index, edge_weight, N, (N, N))
    ref = jax.nn.sigmoid(adj_ref @ (x @ weight.T) + bias)
    assert out.shape == (N, n_class)
    assert jnp.max(jnp.abs(out - ref)) < 2e-2

    print("KERNEL_OK")
</pallas_src>

<mosaic_0001>
module attributes {stable_mosaic.version = 11 : i64} {
  func.func @feature_proj_kernel(%arg0: i32, %arg1: memref<128x128xbf16, #tpu.memory_space<vmem>>, %arg2: memref<128x128xbf16, #tpu.memory_space<vmem>>, %arg3: memref<128x128xbf16, #tpu.memory_space<vmem>>) attributes {dimension_semantics = [#tpu.dimension_semantics<parallel>], iteration_bounds = array<i64: 1>, scalar_prefetch = 0 : i64, scratch_operands = 0 : i64, tpu.core_type = #tpu.core_type<tc>, window_params = [{transform_indices = @transform_0, window_bounds = array<i64: 128, 128>}, {pipeline_mode = #tpu.pipeline_mode<synchronous>, transform_indices = @transform_1, window_bounds = array<i64: 128, 128>}, {transform_indices = @transform_2, window_bounds = array<i64: 128, 128>}]} {
    %c0 = arith.constant 0 : index
    %c0_0 = arith.constant 0 : index
    %0 = vector.load %arg1[%c0, %c0_0] : memref<128x128xbf16, #tpu.memory_space<vmem>>, vector<128x128xbf16>
    %c0_1 = arith.constant 0 : index
    %c0_2 = arith.constant 0 : index
    %1 = vector.load %arg2[%c0_1, %c0_2] : memref<128x128xbf16, #tpu.memory_space<vmem>>, vector<128x128xbf16>
    %cst = arith.constant dense<0.000000e+00> : vector<128x128xf32>
    %2 = tpu.matmul %0, %1, %cst {dimension_numbers = #tpu.dot_dimension_numbers<[1], [0], [0], [1], [0, 0, 1, 1], [], []>} : vector<128x128xbf16>, vector<128x128xbf16>, vector<128x128xf32> -> vector<128x128xf32>
    %3 = arith.truncf %2 : vector<128x128xf32> to vector<128x128xbf16>
    %c0_3 = arith.constant 0 : index
    %c0_4 = arith.constant 0 : index
    %4 = vector.load %arg3[%c0_3, %c0_4] : memref<128x128xbf16, #tpu.memory_space<vmem>>, vector<128x128xbf16>
    tpu.vector_store %arg3[%c0_3, %c0_4], %3 {strides = array<i32>} : memref<128x128xbf16, #tpu.memory_space<vmem>>, vector<128x128xbf16>,
    return
  }
  func.func @transform_0(%arg0: i32) -> (i32, i32) {
    %c0_i32 = arith.constant 0 : i32
    %c0_i32_0 = arith.constant 0 : i32
    return %arg0, %c0_i32 : i32, i32
  }
  func.func @transform_1(%arg0: i32) -> (i32, i32) {
    %c0_i32 = arith.constant 0 : i32
    %c0_i32_0 = arith.constant 0 : i32
    %c0_i32_1 = arith.constant 0 : i32
    return %c0_i32, %c0_i32_0 : i32, i32
  }
  func.func @transform_2(%arg0: i32) -> (i32, i32) {
    %c0_i32 = arith.constant 0 : i32
    %c0_i32_0 = arith.constant 0 : i32
    return %arg0, %c0_i32 : i32, i32
  }
}

</mosaic_0001>

<bundles_post_ra>
// kernel: tpu_custom_call.1
= control target key start
LH: loop header
LB: loop body
LE: loop exit
PB: predicated region body
PF: predicated region fallthrough
CT: control target
= control target key end

     0   :  { %7 = vsyncpa [#allocation3], 0  ;;  %s648_s0 = inlined_call_operand.hbm [shape: bf16[128,128], index: 0, kind: input, shape index: {}]   ;;  %s649_s1 = inlined_call_operand.hbm [shape: bf16[128,128], index: 1, kind: input, shape index: {}]   ;;  %s650_s2 = inlined_call_operand.hbm [shape: bf16[128,128], index: 2, kind: output, shape index: {}]  }
   0x1   :  { %8 = vsyncpa [#allocation6], 0 }
   0x2   :  { %9 = vsyncpa [#allocation4], 0  ;;  %s610_s9 = smov [#allocation2]  }
   0x3   :  { %s15_s10 = sshll.u32 %s610_s9, 4  ;;  %s16_s10 = int_to_ptr.vmem [resolvable:$true] %s15_s10 }
   0x4   :  { %s552_s11 = scalar_lea.vmem %s16_s10, 1024  ;;  %p557_p1 = scmp.lt.s32.totalorder %s16_s10, %s16_s10 }
   0x5   :  { %p553_p0 = scmp.ne.s32.totalorder %s16_s10, %s552_s11  ;;  %p558_p2 = scmp.lt.s32.totalorder %s552_s11, %s552_s11 }
   0x7   :  { %p559_p3 = por %p558_p2, %p557_p1 }
   0x9   :  { %p560_p4 = pnand %p559_p3, %p553_p0 }
   0xb   :  { %563 = shalt.err (!%p560_p4)
}
   0xc   :  { %s611_s12 = smov 64   ;;  %s612_s13 = smov 4  }
   0xd   :  { %21 = dma.hbm_to_vmem [thread:$0]  %s648_s0, 1024, %s16_s10, [#allocation3], %s611_s12, %s611_s12, %s612_s13  }
   0xe   :  { %s613_s16 = smov [#allocation5]  }
   0xf   :  { %s27_s17 = sshll.u32 %s613_s16, 4  ;;  %s28_s17 = int_to_ptr.vmem [resolvable:$true] %s27_s17 }
  0x10   :  { %s572_s18 = scalar_lea.vmem %s28_s17, 1024  ;;  %p577_p6 = scmp.lt.s32.totalorder %s28_s17, %s28_s17 }
  0x11   :  { %p573_p5 = scmp.ne.s32.totalorder %s28_s17, %s572_s18  ;;  %p578_p7 = scmp.lt.s32.totalorder %s572_s18, %s572_s18 }
  0x13   :  { %p579_p8 = por %p578_p7, %p577_p6 }
  0x15   :  { %p580_p9 = pnand %p579_p8, %p573_p5 }
  0x17   :  { %583 = shalt.err (!%p580_p9)
}
  0x18   :  { %33 = dma.hbm_to_vmem [thread:$0]  %s649_s1, 1024, %s28_s17, [#allocation6], %s611_s12, %s611_s12, %s612_s13  }
  0x19   :  { %604 = dma.done.wait [#allocation3], 1024  }
  0x1a   :  { %605 = vsyncadd [#allocation3], 4294966272 }
  0x1b   :  { %606 = dma.done.wait [#allocation6], 1024  }
  0x1c   :  { %607 = vsyncadd [#allocation6], 4294966272  ;;  %v528_v0 = vld [vmem:[#allocation5 + $0x38] sm:$0xff]   ;;  %v529_v1 = vld [vmem:[#allocation5 + $0x30] sm:$0xff]   ;;  %s614_s0 = smov [#allocation7]  }
  0x1d   :  { %475 = vmatprep.subr.bf16.mxu0 %v528_v0  ;;  %507 = vmatprep.subr.bf16.mxu1 %v528_v0  ;;  %v530_v2 = vld [vmem:[#allocation5 + $0x28] sm:$0xff]   ;;  %v531_v3 = vld [vmem:[#allocation5 + $0x20] sm:$0xff]   ;;  %v532_v6 = vld [vmem:[#allocation5 + $0x18] sm:$0xff]   ;;  %s351_s1 = sshll.u32 %s614_s0, 4  ;;  %s352_s1 = int_to_ptr.vmem [resolvable:$true] %s351_s1 }
  0x1e   :  { %476 = vmatpush3.bf16.msra.mxu0 %v528_v0  ;;  %515 = vmatpush3.bf16.msra.mxu1 %v528_v0  ;;  %v536_v4 = vld [vmem:[#allocation2] sm:$0xff]   ;;  %v533_v7 = vld [vmem:[#allocation5 + $0x10] sm:$0xff]   ;;  %v534_v8 = vld [vmem:[#allocation5 + $0x8] sm:$0xff]   ;;  %s584_s21 = scalar_lea.vmem %s352_s1, 1024  ;;  %p589_p11 = scmp.lt.s32.totalorder %s352_s1, %s352_s1 }
  0x1f   :  { %477 = vmatprep.subr.bf16.mxu0 %v529_v1  ;;  %508 = vmatprep.subr.bf16.mxu1 %v529_v1  ;;  %v537_v5 = vld [vmem:[#allocation2 + $0x20] sm:$0xff]   ;;  %v538_v10 = vld [vmem:[#allocation2 + $0x8] sm:$0xff]   ;;  %v540_v12 = vld [vmem:[#allocation2 + $0x10] sm:$0xff]   ;;  %p585_p10 = scmp.ne.s32.totalorder %s352_s1, %s584_s21  ;;  %p590_p12 = scmp.lt.s32.totalorder %s584_s21, %s584_s21 }
  0x20   :  { %491 = vmatprep.mubr.bf16.mxu0 %v536_v4  ;;  %499 = vmatprep.mubr.bf16.mxu1 %v537_v5  ;;  %v535_v9 = vld [vmem:[#allocation5] sm:$0xff]   ;;  %v539_v11 = vld [vmem:[#allocation2 + $0x28] sm:$0xff]   ;;  %v541_v13 = vld [vmem:[#allocation2 + $0x30] sm:$0xff]  }
  0x21   :  { %v542_v14 = vld [vmem:[#allocation2 + $0x18] sm:$0xff]   ;;  %p591_p13 = por %p590_p12, %p589_p11 }
  0x22   :  { %478 = vmatpush3.bf16.msra.mxu0 %v529_v1  ;;  %516 = vmatpush3.bf16.msra.mxu1 %v529_v1  ;;  %v543_v15 = vld [vmem:[#allocation2 + $0x38] sm:$0xff]  }
  0x23   :  { %479 = vmatprep.subr.bf16.mxu0 %v530_v2  ;;  %509 = vmatprep.subr.bf16.mxu1 %v530_v2  ;;  %p592_p0 = pnand %p591_p13, %p585_p10 }
  0x26   :  { %480 = vmatpush3.bf16.msra.mxu0 %v530_v2  ;;  %517 = vmatpush3.bf16.msra.mxu1 %v530_v2 }
  0x27   :  { %481 = vmatprep.subr.bf16.mxu0 %v531_v3  ;;  %510 = vmatprep.subr.bf16.mxu1 %v531_v3 }
  0x2a   :  { %482 = vmatpush3.bf16.msra.mxu0 %v531_v3  ;;  %518 = vmatpush3.bf16.msra.mxu1 %v531_v3 }
  0x2b   :  { %483 = vmatprep.subr.bf16.mxu0 %v532_v6  ;;  %511 = vmatprep.subr.bf16.mxu1 %v532_v6 }
  0x2e   :  { %484 = vmatpush3.bf16.msra.mxu0 %v532_v6  ;;  %519 = vmatpush3.bf16.msra.mxu1 %v532_v6 }
  0x2f   :  { %485 = vmatprep.subr.bf16.mxu0 %v533_v7  ;;  %512 = vmatprep.subr.bf16.mxu1 %v533_v7 }
  0x32   :  { %486 = vmatpush3.bf16.msra.mxu0 %v533_v7  ;;  %520 = vmatpush3.bf16.msra.mxu1 %v533_v7 }
  0x33   :  { %487 = vmatprep.subr.bf16.mxu0 %v534_v8  ;;  %513 = vmatprep.subr.bf16.mxu1 %v534_v8 }
  0x36   :  { %488 = vmatpush3.bf16.msra.mxu0 %v534_v8  ;;  %521 = vmatpush3.bf16.msra.mxu1 %v534_v8 }
  0x37   :  { %489 = vmatprep.subr.bf16.mxu0 %v535_v9  ;;  %514 = vmatprep.subr.bf16.mxu1 %v535_v9 }
  0x3a   :  { %490 = vmatpush3.bf16.msra.mxu0 %v535_v9  ;;  %522 = vmatpush3.bf16.msra.mxu1 %v535_v9 }
  0x3d   :  { %492 = vmatmul.mubr.bf16.vlgmr.msra.gmra.mxu0 %v538_v10  ;;  %500 = vmatmul.mubr.bf16.vlgmr.msra.gmra.mxu1 %v539_v11 }
  0x3e   :  { %495 = vmatprep.mubr.bf16.mxu0 %v540_v12  ;;  %503 = vmatprep.mubr.bf16.mxu1 %v541_v13 }
  0x45   :  { %496 = vmatmul.mubr.bf16.gmra.mxu0 %v542_v14  ;;  %504 = vmatmul.mubr.bf16.gmra.mxu1 %v543_v15 }
  0xfd   :  { %v493_v16 = vpop.f32.mrf.mxu0  ;;  %v501_v17 = vpop.f32.mrf.mxu1 }
  0xff   :  { %v203_v18 = vpop.f32.mrf.mxu0  ;;  %v235_v19 = vpop.f32.mrf.mxu1 }
 0x101   :  { %v494_v20 = vpop.f32.mrf.mxu0  ;;  %v502_v21 = vpop.f32.mrf.mxu1 }
 0x102   :  { %v420_v22 = vpack.c.bf16 %v494_v20, %v493_v16  ;;  %v440_v23 = vpack.c.bf16 %v502_v21, %v501_v17 }
 0x103   :  { %v206_v24 = vpop.f32.mrf.mxu0  ;;  %v238_v25 = vpop.f32.mrf.mxu1 }
 0x104   :  { %452 = vst [vmem:[#allocation7 + $0x8] sm:$0xff] %v420_v22   ;;  %456 = vst [vmem:[#allocation7 + $0x28] sm:$0xff] %v440_v23   ;;  %v415_v26 = vpack.c.bf16 %v206_v24, %v203_v18  ;;  %v435_v27 = vpack.c.bf16 %v238_v25, %v235_v19 }
 0x105   :  { %v497_v28 = vpop.f32.mrf.mxu0  ;;  %v505_v29 = vpop.f32.mrf.mxu1 }
 0x106   :  { %416 = vst [vmem:[#allocation7] sm:$0xff] %v415_v26   ;;  %455 = vst [vmem:[#allocation7 + $0x20] sm:$0xff] %v435_v27  }
 0x107   :  { %v219_v30 = vpop.f32.mrf.mxu0  ;;  %v251_v31 = vpop.f32.mrf.mxu1 }
 0x109   :  { %v498_v32 = vpop.f32.mrf.mxu0  ;;  %v506_v33 = vpop.f32.mrf.mxu1 }
 0x10a   :  { %v430_v34 = vpack.c.bf16 %v498_v32, %v497_v28  ;;  %v450_v35 = vpack.c.bf16 %v506_v33, %v505_v29 }
 0x10b   :  { %v222_v36 = vpop.f32.mrf.mxu0  ;;  %v254_v37 = vpop.f32.mrf.mxu1 }
 0x10c   :  { %454 = vst [vmem:[#allocation7 + $0x18] sm:$0xff] %v430_v34   ;;  %458 = vst [vmem:[#allocation7 + $0x38] sm:$0xff] %v450_v35   ;;  %v425_v38 = vpack.c.bf16 %v222_v36, %v219_v30  ;;  %v445_v39 = vpack.c.bf16 %v254_v37, %v251_v31 }
 0x10e   :  { %453 = vst [vmem:[#allocation7 + $0x10] sm:$0xff] %v425_v38   ;;  %457 = vst [vmem:[#allocation7 + $0x30] sm:$0xff] %v445_v39  }
 0x10f   :  { %595 = shalt.err (!%p592_p0)
}
 0x110   :  { %357 = dma.vmem_to_hbm [thread:$0]  %s352_s1, 1024, %s650_s2, [#allocation4], %s611_s12, %s611_s12, %s612_s13  }
 0x111   :  { %608 = dma.done.wait [#allocation4], 1024  }
 0x112   :  { %609 = vsyncadd [#allocation4], 4294966272 }
 0x113   :  { %361 = vsyncpa [#allocation3], 1 }
 0x114   :  { %362 = vsyncpa [#allocation6], 1 }
 0x115   :  { %363 = vsyncpa [#allocation4], 1 }

</bundles_post_ra>
